<compile_context>
chip_gen: v6e
topology: v6e:2x2x1
jax: 0.10.0
libtpu: 0.0.40
codegen_flags: <defaults>
</compile_context>

<pallas_src>
import jax
import jax.numpy as jnp
from jax.experimental import pallas as pl
from jax.experimental.pallas import tpu as pltpu


def _round_up(x, m):
    return ((x + m - 1) // m) * m


def _pad_axis(x, axis, new_size):
    if x.shape[axis] == new_size:
        return x
    widths = [(0, 0)] * x.ndim
    widths[axis] = (0, new_size - x.shape[axis])
    return jnp.pad(x, widths)


def _vmem_limit(block_bytes):
    """Scoped-VMEM limit derived from real buffer bytes, capped by chip capacity."""
    try:
        cap = int(pltpu.get_tpu_info().vmem_capacity_bytes)
    except Exception:  # pragma: no cover - conservative fallback (v7x per-TC size)
        cap = 64 * 2 ** 20
    margin = 2 * 2 ** 20
    need = int(block_bytes) + margin
    return int(max(8 * 2 ** 20, min(need, cap - margin)))


# --------------------------------------------------------------------------------------
# Kernels
# --------------------------------------------------------------------------------------
def _q_proj_kernel(q_ref, wq_ref, bq_ref, o_ref):
    # q_ref : (Lq_pad, Dt) question of the current batch
    # wq_ref: (Dt, H_pad)   bq_ref: (1, H_pad)
    # o_ref : (Lq_pad, H_pad) = relu(question @ Wq^T + bq), stored in the fuse dtype.
    q = jnp.dot(q_ref[...], wq_ref[...], preferred_element_type=jnp.float32)
    o_ref[...] = jnp.maximum(q + bq_ref[...], 0.0).astype(o_ref.dtype)


def _fuse_kernel(v_ref, qproj_ref, wv_ref, bv_ref, o_ref):
    # grid = (batch, Lv-tile); both axes are independent ("parallel", "parallel").
    # v_ref    : (TM, Dv)          visual tile of the current batch
    # qproj_ref: (H_pad, H_pad)    hoisted question projection of the current batch
    #                              (constant block index across the Lv-tile axis -> fetched once)
    # wv_ref   : (Dv, H_pad)  bv_ref: (1, H_pad)   (grid-resident)
    # o_ref    : (TM, H_pad)
    v = jnp.dot(v_ref[...], wv_ref[...], preferred_element_type=jnp.float32)
    v = jnp.maximum(v + bv_ref[...], 0.0)            # ReLU; dropout = identity (eval)
    o = jnp.dot(v.astype(qproj_ref.dtype), qproj_ref[...],
                preferred_element_type=jnp.float32)
    o_ref[...] = o.astype(o_ref.dtype)


# --------------------------------------------------------------------------------------
# Wrapper
# --------------------------------------------------------------------------------------
def multimodal_fuse(visual, question, wv_t, bv, wq_t, bq, *,
                    tm=512, out_dtype=None, fuse_dtype=None):
    """visual: (B, Lv, Dv), question: (B, Lq, Dt) with Lq == hidden_size,
    wv_t: (Dv, H), bv: (H,), wq_t: (Dt, H), bq: (H,).  Returns (B, Lv, H).

    out_dtype : dtype of the returned tensor (default: visual.dtype). bf16 halves the
                dominant HBM write traffic when downstream allows.
    fuse_dtype: operand dtype of the fuse matmul / q_proj storage (f32 accumulation is
                always used). Default: bf16 for bf16 inputs, f32 otherwise.
    """
    B, Lv, Dv = visual.shape
    Bq, Lq, Dt = question.shape
    H = wv_t.shape[1]
    assert Bq == B
    assert Lq == H, "torch.matmul(visual, question) requires question.shape[-2] == hidden_size"

    out_dtype = visual.dtype if out_dtype is None else jnp.dtype(out_dtype)
    if fuse_dtype is None:
        fuse_dtype = jnp.bfloat16 if visual.dtype == jnp.bfloat16 else jnp.float32
    fuse_dtype = jnp.dtype(fuse_dtype)

    isz = jnp.dtype(visual.dtype).itemsize
    wsz = jnp.dtype(wv_t.dtype).itemsize
    csz = fuse_dtype.itemsize
    osz = jnp.dtype(out_dtype).itemsize

    # ---- TPU-friendly padding ----------------------------------------------------------
    row_align = {4: 8, 2: 16, 1: 32}.get(isz, 8)     # sublane packing of the input dtype
    H_pad = _round_up(H, 128)                        # lane-dense output stores
    TM = _round_up(min(tm, _round_up(Lv, row_align)), row_align)
    Lv_pad = _round_up(Lv, TM)

    visual_p = _pad_axis(visual, 1, Lv_pad)
    question_p = _pad_axis(question, 1, H_pad)       # Lq axis is the fuse contraction axis
    wv_p = _pad_axis(wv_t, 1, H_pad)
    wq_p = _pad_axis(wq_t, 1, H_pad)
    bv_p = _pad_axis(bv.reshape(1, H), 1, H_pad)
    bq_p = _pad_axis(bq.reshape(1, H), 1, H_pad)
    # CORRECTNESS NOTE (load-bearing): the padded weight/bias columns MUST be zero.
    # They make the padded H columns of the visual projection exactly relu(0)=0, so the
    # padded Lq rows of q_proj (which equal relu(bq) and are generally NONZERO) contribute
    # nothing to the fuse contraction. Do not replace jnp.pad with a nonzero fill.

    # ---- question projection (hoisted): one grid step per batch -------------------------
    q_blk_bytes = 2 * (H_pad * Dt * isz + Dt * H_pad * wsz + H_pad * wsz
                       + H_pad * H_pad * csz)
    q_proj = pl.pallas_call(
        _q_proj_kernel,
        out_shape=jax.ShapeDtypeStruct((B, H_pad, H_pad), fuse_dtype),
        grid_spec=pltpu.PrefetchScalarGridSpec(
            num_scalar_prefetch=0,
            grid=(B,),
            in_specs=[
                pl.BlockSpec((None, H_pad, Dt), lambda b: (b, 0, 0)),   # question (per batch)
                pl.BlockSpec((Dt, H_pad), lambda b: (0, 0)),            # Wq^T (resident)
                pl.BlockSpec((1, H_pad), lambda b: (0, 0)),             # bq
            ],
            out_specs=pl.BlockSpec((None, H_pad, H_pad), lambda b: (b, 0, 0)),
        ),
        compiler_params=pltpu.CompilerParams(
            dimension_semantics=("parallel",),
            vmem_limit_bytes=_vmem_limit(q_blk_bytes),
        ),
        cost_estimate=pl.CostEstimate(
            flops=2 * B * H_pad * Dt * H_pad,
            transcendentals=0,
            bytes_accessed=int(question_p.size * isz + wq_p.size * wsz + bq_p.size * wsz
                               + B * H_pad * H_pad * csz),
        ),
    )(question_p, wq_p, bq_p)

    # ---- fuse: per-Lv-tile visual projection + matmul against q_proj --------------------
    grid = (B, Lv_pad // TM)
    fuse_blk_bytes = 2 * (TM * Dv * isz                 # visual tile (double-buffered)
                          + H_pad * H_pad * csz         # q_proj of current batch
                          + Dv * H_pad * wsz            # Wv^T
                          + H_pad * wsz                 # bv
                          + TM * H_pad * osz)           # output tile
    out = pl.pallas_call(
        _fuse_kernel,
        out_shape=jax.ShapeDtypeStruct((B, Lv_pad, H_pad), out_dtype),
        grid_spec=pltpu.PrefetchScalarGridSpec(
            num_scalar_prefetch=0,
            grid=grid,
            in_specs=[
                pl.BlockSpec((None, TM, Dv), lambda b, t: (b, t, 0)),        # visual tile
                pl.BlockSpec((None, H_pad, H_pad), lambda b, t: (b, 0, 0)),  # q_proj (per batch)
                pl.BlockSpec((Dv, H_pad), lambda b, t: (0, 0)),              # Wv^T (resident)
                pl.BlockSpec((1, H_pad), lambda b, t: (0, 0)),               # bv
            ],
            out_specs=pl.BlockSpec((None, TM, H_pad), lambda b, t: (b, t, 0)),
        ),
        compiler_params=pltpu.CompilerParams(
            # No cross-iteration state: both axes independent -> megacore can shard over
            # batch AND Lv tiles (important for small / odd B on v7x's 2 TensorCores).
            dimension_semantics=("parallel", "parallel"),
            vmem_limit_bytes=_vmem_limit(fuse_blk_bytes),
        ),
        cost_estimate=pl.CostEstimate(
            flops=2 * B * Lv_pad * Dv * H_pad + 2 * B * Lv_pad * H_pad * H_pad,
            transcendentals=0,
            bytes_accessed=int(visual_p.size * isz + q_proj.size * csz
                               + wv_p.size * wsz + bv_p.size * wsz
                               + B * Lv_pad * H_pad * osz),
        ),
    )(visual_p, q_proj, wv_p, bv_p)

    return out[:, :Lv, :H]


def reference(visual, question, wv_t, bv, wq_t, bq):
    v = jax.nn.relu(jnp.einsum("bld,dh->blh", visual, wv_t) + bv)
    q = jax.nn.relu(jnp.einsum("bld,dh->blh", question, wq_t) + bq)
    return jnp.einsum("blh,bhk->blk", v, q)


if __name__ == "__main__":
    # Small shapes consistent with the module. hidden_size deliberately NOT a multiple of
    # 128 and Lv NOT a multiple of the tile, to exercise both padding paths.
    B = 2
    visual_size = 16
    text_size = 12
    hidden_size = 160
    Lv = 300
    Lq = hidden_size           # required by torch.matmul(visual, question)

    key = jax.random.PRNGKey(0)
    k1, k2, k3, k4, k5, k6 = jax.random.split(key, 6)

    visual = jax.random.normal(k1, (B, Lv, visual_size), dtype=jnp.float32)
    question = jax.random.normal(k2, (B, Lq, text_size), dtype=jnp.float32)

    # Deterministic parameter init (nn.Linear shapes: W (H, in), b (H,)).
    wv = jax.random.normal(k3, (hidden_size, visual_size), dtype=jnp.float32) * 0.1
    bv = jax.random.normal(k4, (hidden_size,), dtype=jnp.float32) * 0.1
    wq = jax.random.normal(k5, (hidden_size, text_size), dtype=jnp.float32) * 0.1
    bq = jax.random.normal(k6, (hidden_size,), dtype=jnp.float32) * 0.1

    ref = reference(visual, question, wv.T, bv, wq.T, bq)

    # Default path: TM = min(512, Lv) -> one big row tile per batch.
    out = multimodal_fuse(visual, question, wv.T, bv, wq.T, bq)
    out = jax.block_until_ready(out)
    assert out.shape == (B, Lv, hidden_size)
    assert jnp.allclose(out, ref, atol=1e-3, rtol=1e-3), float(jnp.max(jnp.abs(out - ref)))

    # Multi-tile path: TM = 128 -> 3 Lv tiles per batch (exercises padded tail tile).
    out2 = multimodal_fuse(visual, question, wv.T, bv, wq.T, bq, tm=128)
    out2 = jax.block_until_ready(out2)
    assert out2.shape == (B, Lv, hidden_size)
    assert jnp.allclose(out2, ref, atol=1e-3, rtol=1e-3), float(jnp.max(jnp.abs(out2 - ref)))

    print("KERNEL_OK")
</pallas_src>

<mosaic_0001>
module attributes {stable_mosaic.version = 11 : i64} {
  func.func @_q_proj_kernel(%arg0: i32, %arg1: memref<1x256x12xf32, #tpu.memory_space<vmem>>, %arg2: memref<12x256xf32, #tpu.memory_space<vmem>>, %arg3: memref<1x256xf32, #tpu.memory_space<vmem>>, %arg4: memref<1x256x256xf32, #tpu.memory_space<vmem>>) attributes {dimension_semantics = [#tpu.dimension_semantics<parallel>], iteration_bounds = array<i64: 2>, scalar_prefetch = 0 : i64, scratch_operands = 0 : i64, tpu.core_type = #tpu.core_type<tc>, window_params = [{transform_indices = @transform_0, window_bounds = array<i64: 1, 256, 12>}, {pipeline_mode = #tpu.pipeline_mode<synchronous>, transform_indices = @transform_1, window_bounds = array<i64: 12, 256>}, {pipeline_mode = #tpu.pipeline_mode<synchronous>, transform_indices = @transform_2, window_bounds = array<i64: 1, 256>}, {transform_indices = @transform_3, window_bounds = array<i64: 1, 256, 256>}]} {
    %c0 = arith.constant 0 : index
    %c0_0 = arith.constant 0 : index
    %c0_1 = arith.constant 0 : index
    %0 = vector.load %arg1[%c0, %c0_0, %c0_1] : memref<1x256x12xf32, #tpu.memory_space<vmem>>, vector<1x256x12xf32>
    %1 = vector.shape_cast %0 : vector<1x256x12xf32> to vector<256x12xf32>
    %c0_2 = arith.constant 0 : index
    %c0_3 = arith.constant 0 : index
    %2 = vector.load %arg2[%c0_2, %c0_3] : memref<12x256xf32, #tpu.memory_space<vmem>>, vector<12x256xf32>
    %cst = arith.constant dense<0.000000e+00> : vector<256x256xf32>
    %3 = tpu.matmul %1, %2, %cst {dimension_numbers = #tpu.dot_dimension_numbers<[1], [0], [0], [1], [0, 0, 1, 1], [], []>} : vector<256x12xf32>, vector<12x256xf32>, vector<256x256xf32> -> vector<256x256xf32>
    %c0_4 = arith.constant 0 : index
    %c0_5 = arith.constant 0 : index
    %4 = vector.load %arg3[%c0_4, %c0_5] : memref<1x256xf32, #tpu.memory_space<vmem>>, vector<1x256xf32>
    %5 = vector.broadcast %4 : vector<1x256xf32> to vector<256x256xf32>
    %6 = arith.addf %3, %5 : vector<256x256xf32>
    %cst_6 = arith.constant 0.000000e+00 : f32
    %7 = vector.broadcast %cst_6 : f32 to vector<256x256xf32>
    %8 = arith.maximumf %6, %7 : vector<256x256xf32>
    %c0_7 = arith.constant 0 : index
    %c0_8 = arith.constant 0 : index
    %c0_9 = arith.constant 0 : index
    %9 = vector.load %arg4[%c0_7, %c0_8, %c0_9] : memref<1x256x256xf32, #tpu.memory_space<vmem>>, vector<1x256x256xf32>
    %10 = vector.shape_cast %9 : vector<1x256x256xf32> to vector<256x256xf32>
    %11 = vector.shape_cast %8 : vector<256x256xf32> to vector<1x256x256xf32>
    tpu.vector_store %arg4[%c0_7, %c0_8, %c0_9], %11 {strides = array<i32>} : memref<1x256x256xf32, #tpu.memory_space<vmem>>, vector<1x256x256xf32>,
    return
  }
  func.func @transform_0(%arg0: i32) -> (i32, i32, i32) {
    %c0_i32 = arith.constant 0 : i32
    %c0_i32_0 = arith.constant 0 : i32
    %c0_i32_1 = arith.constant 0 : i32
    return %arg0, %c0_i32, %c0_i32_0 : i32, i32, i32
  }
  func.func @transform_1(%arg0: i32) -> (i32, i32) {
    %c0_i32 = arith.constant 0 : i32
    %c0_i32_0 = arith.constant 0 : i32
    %c0_i32_1 = arith.constant 0 : i32
    return %c0_i32, %c0_i32_0 : i32, i32
  }
  func.func @transform_2(%arg0: i32) -> (i32, i32) {
    %c0_i32 = arith.constant 0 : i32
    %c0_i32_0 = arith.constant 0 : i32
    %c0_i32_1 = arith.constant 0 : i32
    return %c0_i32, %c0_i32_0 : i32, i32
  }
  func.func @transform_3(%arg0: i32) -> (i32, i32, i32) {
    %c0_i32 = arith.constant 0 : i32
    %c0_i32_0 = arith.constant 0 : i32
    %c0_i32_1 = arith.constant 0 : i32
    return %arg0, %c0_i32, %c0_i32_0 : i32, i32, i32
  }
}

</mosaic_0001>

<bundles_post_ra>
// kernel: tpu_custom_call.1
= control target key start
LH: loop header
LB: loop body
LE: loop exit
PB: predicated region body
PF: predicated region fallthrough
CT: control target
= control target key end

     0   :  { %8 = vsyncpa [#allocation3], 0  ;;  %s1316_s0 = inlined_call_operand.vmem [shape: f32[2,256,12], index: 0, kind: input, shape index: {}]   ;;  %s1317_s1 = inlined_call_operand.vmem [shape: f32[12,256], index: 1, kind: input, shape index: {}]   ;;  %s1318_s2 = inlined_call_operand.vmem [shape: f32[1,256], index: 2, kind: input, shape index: {}]   ;;  %s1319_s3 = inlined_call_operand.hbm [shape: f32[2,256,256], index: 3, kind: output, shape index: {}]  }
   0x1   :  { %10 = vsyncpa [#allocation3 + $0x1], 0  ;;  %s962_s12 = smov 0   ;;  %s964_s13 = smov 0  }
   0x2   :  { %s966_s14 = smov 0   ;;  %s968_s15 = smov 0  }
   0x3 LB: > { %s983_s16 = sadd.s32 4294967295, %s936_s15   ;;  %s782_s17 = sadd.s32 4294967294, %s936_s15   ;;  %s936_s15 = sphi %s968_s15, %s1325_s15   ;;  %s932_s14 = sphi %s966_s14, %s1324_s14   ;;  %s928_s13 = sphi %s964_s13, %s1323_s13   ;;  %s924_s12 = sphi %s962_s12, %s1322_s12  }
   0x4   : > { %s987_s18 = sadd.s32 1, %s936_s15   ;;  %s91_s19 = sadd.s32 1, %s932_s14 }
   0x5   : > { %s88_s20 = ssub.s32 %s936_s15, %s987_s18  ;;  %p101_p0 = scmp.ne.s32.totalorder %s932_s14, %s928_s13 }
   0x6   : > { %p89_p1 = scmp.eq.s32.totalorder %s88_s20, 0  ;;  %p102_p2 = scmp.eq.s32.totalorder %s983_s16, 1 }
   0x7   : > { %p107_p3 = scmp.ne.s32.totalorder %s928_s13, %s924_s12  ;;  %p108_p4 = scmp.eq.s32.totalorder %s782_s17, 1 }
   0x8   : > { %s998_s21 = scalar_select %p89_p1, %s932_s14, %s91_s19  }
   0x9   : > { %p1000_p5 = por %p102_p2, %p101_p0  ;;  %p1004_p6 = por %p108_p4, %p107_p3 }
   0xa   : > { %p785_p7 = scmp.ge.s32.totalorder %s936_s15, 1  ;;  %p140_p8 = scmp.lt.s32.totalorder %s936_s15, 3 }
   0xc   : > { %p141_p9 = pnand %p785_p7, %p140_p8 }
   0xd   : > { %p164_p10 = scmp.lt.s32.totalorder (!%p141_p9), %s983_s16, 1  ;;  %s161_s17 = sand.u32 (!%p141_p9), 1, %s928_s13  }
   0xe   : > { %144 = sbr.rel (%p141_p9) target bundleno = 299 (0x12b), region = 32  ;;  %s786_s19 = sshll.u32 (!%p141_p9), %s161_s17, 9 }
   0xf   : > { %s1139_s20 = scalar_lea.vmem (!%p141_p9), [#allocation2], %s786_s19  ;;  %s829_s24 = sshll.u32 (!%p141_p9), %s983_s16, 13 }
  0x10   : > { %s720_s25 = sshll.u32 (!%p141_p9), %s1139_s20, 4  ;;  %s1266_s28 = scalar_lea.hbm (!%p141_p9), %s1319_s3, %s829_s24  ;;  %s1268_s25 = int_to_ptr.vmem [resolvable:$true] %s720_s25 }
  0x11   : > { %s876_s29 = scalar_lea.vmem (!%p141_p9), %s1268_s25, 8192  ;;  %s939_s30 = smov (!%p141_p9), [#allocation2]  }
  0x12   : > { %p877_p11 = scmp.ne.s32.totalorder (!%p141_p9), %s1268_s25, %s876_s29  ;;  %s880_s4 = sshll.u32 (!%p141_p9), %s939_s30, 4  ;;  %s881_s4 = int_to_ptr.vmem [resolvable:$false] %s880_s4 }
  0x13   : > { %v204_v0 = vld [vmem:[%s1317_s1 + $0x18] sm:$0xf]  ;;  %vm314_vm0 = vcmask 1043456   ;;  %v203_v1 = vld [vmem:[%s1317_s1 + $0x10] sm:$0xf]  ;;  %v202_v2 = vld [vmem:[%s1317_s1 + $0x8] sm:$0xff]  ;;  %v207_v37 = vlaneseq  ;;  %p883_p0 = scmp.lt.s32.totalorder %s1268_s25, %s881_s4 }
  0x14   : > { %789 = vmatprep.subr.msk.mxu0 %vm314_vm0, %v204_v0  ;;  %830 = vmatprep.subr.msk.mxu1 %vm314_vm0, %v204_v0  ;;  %v201_v3 = vld [vmem:[%s1317_s1] sm:$0xff]  ;;  %s165_s5 = scalar_select %p164_p10, %s983_s16, 1  ;;  %v938_v4 = vmov 0.0   ;;  %vm217_vm1 = vcmask 97280  }
  0x15   : > { %790 = vmatpush1.msk.msra.mxu0 %vm314_vm0, %v203_v1  ;;  %832 = vmatpush1.msk.msra.mxu1 %vm314_vm0, %v203_v1  ;;  %v208_v38 = vshrl.u32 %v207_v37, 7  ;;  %v205_v40 = vld [vmem:[%s1318_s2] sm:$0x3]  ;;  %s1276_s16 = scalar_lea.sflag [#allocation3], %s161_s17  ;;  %p878_p12 = pnand %p877_p11, %p1000_p5 }
  0x16   : > { %351 = vmatprep.subr.mxu0 %v202_v2  ;;  %831 = vmatprep.subr.mxu1 %v202_v2  ;;  %s828_s6 = sshll.u32 %s165_s5, 8  ;;  %s882_s5 = scalar_lea.vmem %s881_s4, 16384 }
  0x17   : > { %352 = vmatpush1.msra.mxu0 %v201_v3  ;;  %833 = vmatpush1.msra.mxu1 %v201_v3  ;;  %s1029_s9 = scalar_lea.vmem %s1316_s0, %s828_s6  ;;  %v209_v39 = vsub.s32 0, %v208_v38  ;;  %v213_v41 = vsub.s32 1, %v208_v38  ;;  %p879_p13 = pneg %p878_p12 }
  0x18   : > { %385 = vmatprep.mubr.f32.mxu0 %v938_v4  ;;  %481 = vmatprep.mubr.f32.mxu1 %v938_v4  ;;  %v169_v5 = vld [vmem:[%s1029_s9] sm:$0xff]  ;;  %v170_v7 = vld [vmem:[%s1029_s9 + $0x8] sm:$0xff]  ;;  %v171_v9 = vld [vmem:[%s1029_s9 + $0x10] sm:$0xff]  ;;  %p884_p1 = scmp.lt.s32.totalorder %s882_s5, %s876_s29 }
  0x19   : > { %v185_v6 = vld [vmem:[%s1029_s9 + $0x80] sm:$0xff]  ;;  %791 = vmatmul.mubr.msk.f32.vlgmr.msra.gmra.mxu0 %vm217_vm1, %v169_v5  ;;  %v186_v8 = vld [vmem:[%s1029_s9 + $0x88] sm:$0xff]  ;;  %v187_v10 = vld [vmem:[%s1029_s9 + $0x90] sm:$0xff]  ;;  %v1129_v42 = vrot.slane %v205_v40, %v209_v39  ;;  %v1133_v43 = vrot.slane %v205_v40, %v213_v41 }
  0x1a   : > { %807 = vmatmul.mubr.msk.f32.vlgmr.msra.gmra.mxu1 %vm217_vm1, %v185_v6  ;;  %391 = vmatprep.mubr.f32.mxu0 %v938_v4  ;;  %v172_v11 = vld [vmem:[%s1029_s9 + $0x18] sm:$0xff]  ;;  %v173_v13 = vld [vmem:[%s1029_s9 + $0x20] sm:$0xff]  ;;  %v174_v15 = vld [vmem:[%s1029_s9 + $0x28] sm:$0xff]  ;;  %p885_p2 = por %p884_p1, %p883_p0 }
  0x1b   : > { %487 = vmatprep.mubr.f32.mxu1 %v938_v4  ;;  %v188_v12 = vld [vmem:[%s1029_s9 + $0x98] sm:$0xff]  ;;  %v189_v14 = vld [vmem:[%s1029_s9 + $0xa0] sm:$0xff]  ;;  %v190_v16 = vld [vmem:[%s1029_s9 + $0xa8] sm:$0xff] }
  0x1c   : > { %v175_v17 = vld [vmem:[%s1029_s9 + $0x30] sm:$0xff]  ;;  %v176_v19 = vld [vmem:[%s1029_s9 + $0x38] sm:$0xff]  ;;  %v177_v21 = vld [vmem:[%s1029_s9 + $0x40] sm:$0xff]  ;;  %p886_p3 = pnand %p885_p2, %p879_p13 }
  0x1d   : > { %792 = vmatmul.mubr.msk.f32.gmra.mxu0 %vm217_vm1, %v170_v7  ;;  %v191_v18 = vld [vmem:[%s1029_s9 + $0xb0] sm:$0xff]  ;;  %v192_v20 = vld [vmem:[%s1029_s9 + $0xb8] sm:$0xff]  ;;  %v193_v22 = vld [vmem:[%s1029_s9 + $0xc0] sm:$0xff] }
  0x1e   : > { %808 = vmatmul.mubr.msk.f32.gmra.mxu1 %vm217_vm1, %v186_v8  ;;  %397 = vmatprep.mubr.f32.mxu0 %v938_v4  ;;  %v178_v23 = vld [vmem:[%s1029_s9 + $0x48] sm:$0xff]  ;;  %v179_v25 = vld [vmem:[%s1029_s9 + $0x50] sm:$0xff]  ;;  %v180_v27 = vld [vmem:[%s1029_s9 + $0x58] sm:$0xff] }
  0x1f   : > { %493 = vmatprep.mubr.f32.mxu1 %v938_v4  ;;  %v194_v24 = vld [vmem:[%s1029_s9 + $0xc8] sm:$0xff]  ;;  %v195_v26 = vld [vmem:[%s1029_s9 + $0xd0] sm:$0xff]  ;;  %v196_v28 = vld [vmem:[%s1029_s9 + $0xd8] sm:$0xff] }
  0x20   : > { %v181_v29 = vld [vmem:[%s1029_s9 + $0x60] sm:$0xff]  ;;  %v182_v31 = vld [vmem:[%s1029_s9 + $0x68] sm:$0xff]  ;;  %v183_v33 = vld [vmem:[%s1029_s9 + $0x70] sm:$0xff] }
  0x21   : > { %793 = vmatmul.mubr.msk.f32.gmra.mxu0 %vm217_vm1, %v171_v9  ;;  %v197_v30 = vld [vmem:[%s1029_s9 + $0xe0] sm:$0xff]  ;;  %v198_v32 = vld [vmem:[%s1029_s9 + $0xe8] sm:$0xff]  ;;  %v199_v34 = vld [vmem:[%s1029_s9 + $0xf0] sm:$0xff] }
  0x22   : > { %809 = vmatmul.mubr.msk.f32.gmra.mxu1 %vm217_vm1, %v187_v10  ;;  %403 = vmatprep.mubr.f32.mxu0 %v938_v4  ;;  %v184_v35 = vld [vmem:[%s1029_s9 + $0x78] sm:$0xff] }
  0x23   : > { %499 = vmatprep.mubr.f32.mxu1 %v938_v4  ;;  %v200_v36 = vld [vmem:[%s1029_s9 + $0xf8] sm:$0xff] }
  0x25   : > { %794 = vmatmul.mubr.msk.f32.gmra.mxu0 %vm217_vm1, %v172_v11 }
  0x26   : > { %810 = vmatmul.mubr.msk.f32.gmra.mxu1 %vm217_vm1, %v188_v12  ;;  %409 = vmatprep.mubr.f32.mxu0 %v938_v4 }
  0x27   : > { %505 = vmatprep.mubr.f32.mxu1 %v938_v4 }
  0x29   : > { %795 = vmatmul.mubr.msk.f32.gmra.mxu0 %vm217_vm1, %v173_v13 }
  0x2a   : > { %811 = vmatmul.mubr.msk.f32.gmra.mxu1 %vm217_vm1, %v189_v14  ;;  %415 = vmatprep.mubr.f32.mxu0 %v938_v4 }
  0x2b   : > { %511 = vmatprep.mubr.f32.mxu1 %v938_v4 }
  0x2d   : > { %796 = vmatmul.mubr.msk.f32.gmra.mxu0 %vm217_vm1, %v174_v15 }
  0x2e   : > { %812 = vmatmul.mubr.msk.f32.gmra.mxu1 %vm217_vm1, %v190_v16  ;;  %421 = vmatprep.mubr.f32.mxu0 %v938_v4 }
  0x2f   : > { %517 = vmatprep.mubr.f32.mxu1 %v938_v4 }
  0x31   : > { %797 = vmatmul.mubr.msk.f32.gmra.mxu0 %vm217_vm1, %v175_v17 }
  0x32   : > { %813 = vmatmul.mubr.msk.f32.gmra.mxu1 %vm217_vm1, %v191_v18  ;;  %427 = vmatprep.mubr.f32.mxu0 %v938_v4 }
  0x33   : > { %523 = vmatprep.mubr.f32.mxu1 %v938_v4 }
  0x35   : > { %798 = vmatmul.mubr.msk.f32.gmra.mxu0 %vm217_vm1, %v176_v19 }
  0x36   : > { %814 = vmatmul.mubr.msk.f32.gmra.mxu1 %vm217_vm1, %v192_v20  ;;  %433 = vmatprep.mubr.f32.mxu0 %v938_v4 }
  0x37   : > { %529 = vmatprep.mubr.f32.mxu1 %v938_v4 }
  0x39   : > { %799 = vmatmul.mubr.msk.f32.gmra.mxu0 %vm217_vm1, %v177_v21 }
  0x3a   : > { %815 = vmatmul.mubr.msk.f32.gmra.mxu1 %vm217_vm1, %v193_v22  ;;  %439 = vmatprep.mubr.f32.mxu0 %v938_v4 }
  0x3b   : > { %535 = vmatprep.mubr.f32.mxu1 %v938_v4 }
  0x3d   : > { %800 = vmatmul.mubr.msk.f32.gmra.mxu0 %vm217_vm1, %v178_v23 }
  0x3e   : > { %816 = vmatmul.mubr.msk.f32.gmra.mxu1 %vm217_vm1, %v194_v24  ;;  %445 = vmatprep.mubr.f32.mxu0 %v938_v4 }
  0x3f   : > { %541 = vmatprep.mubr.f32.mxu1 %v938_v4 }
  0x41   : > { %801 = vmatmul.mubr.msk.f32.gmra.mxu0 %vm217_vm1, %v179_v25 }
  0x42   : > { %817 = vmatmul.mubr.msk.f32.gmra.mxu1 %vm217_vm1, %v195_v26  ;;  %451 = vmatprep.mubr.f32.mxu0 %v938_v4 }
  0x43   : > { %547 = vmatprep.mubr.f32.mxu1 %v938_v4 }
  0x45   : > { %802 = vmatmul.mubr.msk.f32.gmra.mxu0 %vm217_vm1, %v180_v27 }
  0x46   : > { %818 = vmatmul.mubr.msk.f32.gmra.mxu1 %vm217_vm1, %v196_v28  ;;  %457 = vmatprep.mubr.f32.mxu0 %v938_v4 }
  0x47   : > { %553 = vmatprep.mubr.f32.mxu1 %v938_v4 }
  0x49   : > { %803 = vmatmul.mubr.msk.f32.gmra.mxu0 %vm217_vm1, %v181_v29 }
  0x4a   : > { %819 = vmatmul.mubr.msk.f32.gmra.mxu1 %vm217_vm1, %v197_v30  ;;  %463 = vmatprep.mubr.f32.mxu0 %v938_v4 }
  0x4b   : > { %559 = vmatprep.mubr.f32.mxu1 %v938_v4 }
  0x4d   : > { %804 = vmatmul.mubr.msk.f32.gmra.mxu0 %vm217_vm1, %v182_v31 }
  0x4e   : > { %820 = vmatmul.mubr.msk.f32.gmra.mxu1 %vm217_vm1, %v198_v32  ;;  %469 = vmatprep.mubr.f32.mxu0 %v938_v4 }
  0x4f   : > { %565 = vmatprep.mubr.f32.mxu1 %v938_v4 }
  0x51   : > { %805 = vmatmul.mubr.msk.f32.gmra.mxu0 %vm217_vm1, %v183_v33 }
  0x52   : > { %821 = vmatmul.mubr.msk.f32.gmra.mxu1 %vm217_vm1, %v199_v34  ;;  %475 = vmatprep.mubr.f32.mxu0 %v938_v4 }
  0x53   : > { %571 = vmatprep.mubr.f32.mxu1 %v938_v4 }
  0x55   : > { %806 = vmatmul.mubr.msk.f32.gmra.mxu0 %vm217_vm1, %v184_v35 }
  0x56   : > { %822 = vmatmul.mubr.msk.f32.gmra.mxu1 %vm217_vm1, %v200_v36 }
  0xd9   : > { %v387_v44 = vpop.f32.mrf.mxu0 }
  0xda   : > { %v483_v45 = vpop.f32.mrf.mxu1  ;;  %v388_v46 = vadd.f32 %v387_v44, %v1129_v42 }
  0xdb   : > { %v484_v47 = vadd.f32 %v483_v45, %v1129_v42  ;;  %v389_v48 = vpop.f32.mrf.mxu0 }
  0xdc   : > { %v485_v49 = vpop.f32.mrf.mxu1  ;;  %v578_v50 = vmax.f32 %v388_v46, 0.0  ;;  %v390_v52 = vadd.f32 %v389_v48, %v1133_v43 }
  0xdd   : > { %v610_v51 = vmax.f32 %v484_v47, 0.0  ;;  %v486_v53 = vadd.f32 %v485_v49, %v1133_v43  ;;  %v393_v54 = vpop.f32.mrf.mxu0 }
  0xde   : > { %v489_v55 = vpop.f32.mrf.mxu1  ;;  %642 = vst [vmem:[%s1139_s20] sm:$0xff] %v578_v50  ;;  %v579_v56 = vmax.f32 %v390_v52, 0.0  ;;  %v394_v58 = vadd.f32 %v393_v54, %v1129_v42 }
  0xdf   : > { %674 = vst [vmem:[%s1139_s20 + $0x100] sm:$0xff] %v610_v51  ;;  %v611_v57 = vmax.f32 %v486_v53, 0.0  ;;  %v490_v59 = vadd.f32 %v489_v55, %v1129_v42  ;;  %v395_v60 = vpop.f32.mrf.mxu0 }
  0xe0   : > { %v491_v61 = vpop.f32.mrf.mxu1  ;;  %643 = vst [vmem:[%s1139_s20 + $0x8] sm:$0xff] %v579_v56  ;;  %v580_v62 = vmax.f32 %v394_v58, 0.0  ;;  %v396_v0 = vadd.f32 %v395_v60, %v1133_v43 }
  0xe1   : > { %675 = vst [vmem:[%s1139_s20 + $0x108] sm:$0xff] %v611_v57  ;;  %v612_v63 = vmax.f32 %v490_v59, 0.0  ;;  %v492_v1 = vadd.f32 %v491_v61, %v1133_v43  ;;  %v399_v2 = vpop.f32.mrf.mxu0 }
  0xe2   : > { %v495_v3 = vpop.f32.mrf.mxu1  ;;  %644 = vst [vmem:[%s1139_s20 + $0x10] sm:$0xff] %v580_v62  ;;  %v581_v4 = vmax.f32 %v396_v0, 0.0  ;;  %v400_v6 = vadd.f32 %v399_v2, %v1129_v42 }
  0xe3   : > { %676 = vst [vmem:[%s1139_s20 + $0x110] sm:$0xff] %v612_v63  ;;  %v613_v5 = vmax.f32 %v492_v1, 0.0  ;;  %v496_v7 = vadd.f32 %v495_v3, %v1129_v42  ;;  %v401_v8 = vpop.f32.mrf.mxu0 }
  0xe4   : > { %v497_v9 = vpop.f32.mrf.mxu1  ;;  %645 = vst [vmem:[%s1139_s20 + $0x18] sm:$0xff] %v581_v4  ;;  %v582_v10 = vmax.f32 %v400_v6, 0.0  ;;  %v402_v12 = vadd.f32 %v401_v8, %v1133_v43 }
  0xe5   : > { %677 = vst [vmem:[%s1139_s20 + $0x118] sm:$0xff] %v613_v5  ;;  %v614_v11 = vmax.f32 %v496_v7, 0.0  ;;  %v498_v13 = vadd.f32 %v497_v9, %v1133_v43  ;;  %v405_v14 = vpop.f32.mrf.mxu0 }
  0xe6   : > { %v501_v15 = vpop.f32.mrf.mxu1  ;;  %646 = vst [vmem:[%s1139_s20 + $0x20] sm:$0xff] %v582_v10  ;;  %v583_v16 = vmax.f32 %v402_v12, 0.0  ;;  %v406_v18 = vadd.f32 %v405_v14, %v1129_v42 }
  0xe7   : > { %678 = vst [vmem:[%s1139_s20 + $0x120] sm:$0xff] %v614_v11  ;;  %v615_v17 = vmax.f32 %v498_v13, 0.0  ;;  %v502_v19 = vadd.f32 %v501_v15, %v1129_v42  ;;  %v407_v20 = vpop.f32.mrf.mxu0 }
  0xe8   : > { %v503_v21 = vpop.f32.mrf.mxu1  ;;  %647 = vst [vmem:[%s1139_s20 + $0x28] sm:$0xff] %v583_v16  ;;  %v584_v22 = vmax.f32 %v406_v18, 0.0  ;;  %v408_v24 = vadd.f32 %v407_v20, %v1133_v43 }
  0xe9   : > { %679 = vst [vmem:[%s1139_s20 + $0x128] sm:$0xff] %v615_v17  ;;  %v616_v23 = vmax.f32 %v502_v19, 0.0  ;;  %v504_v25 = vadd.f32 %v503_v21, %v1133_v43  ;;  %v411_v26 = vpop.f32.mrf.mxu0 }
  0xea   : > { %v507_v27 = vpop.f32.mrf.mxu1  ;;  %648 = vst [vmem:[%s1139_s20 + $0x30] sm:$0xff] %v584_v22  ;;  %v585_v28 = vmax.f32 %v408_v24, 0.0  ;;  %v412_v30 = vadd.f32 %v411_v26, %v1129_v42 }
  0xeb   : > { %680 = vst [vmem:[%s1139_s20 + $0x130] sm:$0xff] %v616_v23  ;;  %v617_v29 = vmax.f32 %v504_v25, 0.0  ;;  %v508_v31 = vadd.f32 %v507_v27, %v1129_v42  ;;  %v413_v32 = vpop.f32.mrf.mxu0 }
  0xec   : > { %v509_v33 = vpop.f32.mrf.mxu1  ;;  %649 = vst [vmem:[%s1139_s20 + $0x38] sm:$0xff] %v585_v28  ;;  %v586_v34 = vmax.f32 %v412_v30, 0.0  ;;  %v414_v36 = vadd.f32 %v413_v32, %v1133_v43 }
  0xed   : > { %681 = vst [vmem:[%s1139_s20 + $0x138] sm:$0xff] %v617_v29  ;;  %v618_v35 = vmax.f32 %v508_v31, 0.0  ;;  %v510_v37 = vadd.f32 %v509_v33, %v1133_v43  ;;  %v417_v38 = vpop.f32.mrf.mxu0 }
  0xee   : > { %v513_v39 = vpop.f32.mrf.mxu1  ;;  %650 = vst [vmem:[%s1139_s20 + $0x40] sm:$0xff] %v586_v34  ;;  %v587_v40 = vmax.f32 %v414_v36, 0.0  ;;  %v418_v44 = vadd.f32 %v417_v38, %v1129_v42 }
  0xef   : > { %682 = vst [vmem:[%s1139_s20 + $0x140] sm:$0xff] %v618_v35  ;;  %v619_v41 = vmax.f32 %v510_v37, 0.0  ;;  %v514_v45 = vadd.f32 %v513_v39, %v1129_v42  ;;  %v419_v46 = vpop.f32.mrf.mxu0 }
  0xf0   : > { %v515_v47 = vpop.f32.mrf.mxu1  ;;  %651 = vst [vmem:[%s1139_s20 + $0x48] sm:$0xff] %v587_v40  ;;  %v588_v48 = vmax.f32 %v418_v44, 0.0  ;;  %v420_v50 = vadd.f32 %v419_v46, %v1133_v43 }
  0xf1   : > { %683 = vst [vmem:[%s1139_s20 + $0x148] sm:$0xff] %v619_v41  ;;  %v620_v49 = vmax.f32 %v514_v45, 0.0  ;;  %v516_v51 = vadd.f32 %v515_v47, %v1133_v43  ;;  %v423_v52 = vpop.f32.mrf.mxu0 }
  0xf2   : > { %v519_v53 = vpop.f32.mrf.mxu1  ;;  %652 = vst [vmem:[%s1139_s20 + $0x50] sm:$0xff] %v588_v48  ;;  %v589_v54 = vmax.f32 %v420_v50, 0.0  ;;  %v424_v56 = vadd.f32 %v423_v52, %v1129_v42 }
  0xf3   : > { %684 = vst [vmem:[%s1139_s20 + $0x150] sm:$0xff] %v620_v49  ;;  %v621_v55 = vmax.f32 %v516_v51, 0.0  ;;  %v520_v57 = vadd.f32 %v519_v53, %v1129_v42  ;;  %v425_v58 = vpop.f32.mrf.mxu0 }
  0xf4   : > { %v521_v59 = vpop.f32.mrf.mxu1  ;;  %653 = vst [vmem:[%s1139_s20 + $0x58] sm:$0xff] %v589_v54  ;;  %v590_v60 = vmax.f32 %v424_v56, 0.0  ;;  %v426_v62 = vadd.f32 %v425_v58, %v1133_v43 }
  0xf5   : > { %685 = vst [vmem:[%s1139_s20 + $0x158] sm:$0xff] %v621_v55  ;;  %v622_v61 = vmax.f32 %v520_v57, 0.0  ;;  %v522_v63 = vadd.f32 %v521_v59, %v1133_v43  ;;  %v429_v0 = vpop.f32.mrf.mxu0 }
  0xf6   : > { %v525_v1 = vpop.f32.mrf.mxu1  ;;  %654 = vst [vmem:[%s1139_s20 + $0x60] sm:$0xff] %v590_v60  ;;  %v591_v2 = vmax.f32 %v426_v62, 0.0  ;;  %v430_v4 = vadd.f32 %v429_v0, %v1129_v42 }
  0xf7   : > { %686 = vst [vmem:[%s1139_s20 + $0x160] sm:$0xff] %v622_v61  ;;  %v623_v3 = vmax.f32 %v522_v63, 0.0  ;;  %v526_v5 = vadd.f32 %v525_v1, %v1129_v42  ;;  %v431_v6 = vpop.f32.mrf.mxu0 }
  0xf8   : > { %v527_v7 = vpop.f32.mrf.mxu1  ;;  %655 = vst [vmem:[%s1139_s20 + $0x68] sm:$0xff] %v591_v2  ;;  %v592_v8 = vmax.f32 %v430_v4, 0.0  ;;  %v432_v10 = vadd.f32 %v431_v6, %v1133_v43 }
  0xf9   : > { %687 = vst [vmem:[%s1139_s20 + $0x168] sm:$0xff] %v623_v3  ;;  %v624_v9 = vmax.f32 %v526_v5, 0.0  ;;  %v528_v11 = vadd.f32 %v527_v7, %v1133_v43  ;;  %v435_v12 = vpop.f32.mrf.mxu0 }
  0xfa   : > { %v531_v13 = vpop.f32.mrf.mxu1  ;;  %656 = vst [vmem:[%s1139_s20 + $0x70] sm:$0xff] %v592_v8  ;;  %v593_v14 = vmax.f32 %v432_v10, 0.0  ;;  %v436_v16 = vadd.f32 %v435_v12, %v1129_v42 }
  0xfb   : > { %688 = vst [vmem:[%s1139_s20 + $0x170] sm:$0xff] %v624_v9  ;;  %v625_v15 = vmax.f32 %v528_v11, 0.0  ;;  %v532_v17 = vadd.f32 %v531_v13, %v1129_v42  ;;  %v437_v18 = vpop.f32.mrf.mxu0 }
  0xfc   : > { %v533_v19 = vpop.f32.mrf.mxu1  ;;  %657 = vst [vmem:[%s1139_s20 + $0x78] sm:$0xff] %v593_v14  ;;  %v594_v20 = vmax.f32 %v436_v16, 0.0  ;;  %v438_v22 = vadd.f32 %v437_v18, %v1133_v43 }
  0xfd   : > { %689 = vst [vmem:[%s1139_s20 + $0x178] sm:$0xff] %v625_v15  ;;  %v626_v21 = vmax.f32 %v532_v17, 0.0  ;;  %v534_v23 = vadd.f32 %v533_v19, %v1133_v43  ;;  %v441_v24 = vpop.f32.mrf.mxu0 }
  0xfe   : > { %v537_v25 = vpop.f32.mrf.mxu1  ;;  %658 = vst [vmem:[%s1139_s20 + $0x80] sm:$0xff] %v594_v20  ;;  %v595_v26 = vmax.f32 %v438_v22, 0.0  ;;  %v442_v28 = vadd.f32 %v441_v24, %v1129_v42 }
  0xff   : > { %690 = vst [vmem:[%s1139_s20 + $0x180] sm:$0xff] %v626_v21  ;;  %v627_v27 = vmax.f32 %v534_v23, 0.0  ;;  %v538_v29 = vadd.f32 %v537_v25, %v1129_v42  ;;  %v443_v30 = vpop.f32.mrf.mxu0 }
 0x100   : > { %v539_v31 = vpop.f32.mrf.mxu1  ;;  %659 = vst [vmem:[%s1139_s20 + $0x88] sm:$0xff] %v595_v26  ;;  %v596_v32 = vmax.f32 %v442_v28, 0.0  ;;  %v444_v34 = vadd.f32 %v443_v30, %v1133_v43 }
 0x101   : > { %691 = vst [vmem:[%s1139_s20 + $0x188] sm:$0xff] %v627_v27  ;;  %v628_v33 = vmax.f32 %v538_v29, 0.0  ;;  %v540_v35 = vadd.f32 %v539_v31, %v1133_v43  ;;  %v447_v36 = vpop.f32.mrf.mxu0 }
 0x102   : > { %v543_v37 = vpop.f32.mrf.mxu1  ;;  %660 = vst [vmem:[%s1139_s20 + $0x90] sm:$0xff] %v596_v32  ;;  %v597_v38 = vmax.f32 %v444_v34, 0.0  ;;  %v448_v40 = vadd.f32 %v447_v36, %v1129_v42 }
 0x103   : > { %692 = vst [vmem:[%s1139_s20 + $0x190] sm:$0xff] %v628_v33  ;;  %v629_v39 = vmax.f32 %v540_v35, 0.0  ;;  %v544_v41 = vadd.f32 %v543_v37, %v1129_v42  ;;  %v449_v44 = vpop.f32.mrf.mxu0 }
 0x104   : > { %v545_v45 = vpop.f32.mrf.mxu1  ;;  %661 = vst [vmem:[%s1139_s20 + $0x98] sm:$0xff] %v597_v38  ;;  %v598_v46 = vmax.f32 %v448_v40, 0.0  ;;  %v450_v48 = vadd.f32 %v449_v44, %v1133_v43 }
 0x105   : > { %693 = vst [vmem:[%s1139_s20 + $0x198] sm:$0xff] %v629_v39  ;;  %v630_v47 = vmax.f32 %v544_v41, 0.0  ;;  %v546_v49 = vadd.f32 %v545_v45, %v1133_v43  ;;  %v453_v50 = vpop.f32.mrf.mxu0 }
 0x106   : > { %v549_v51 = vpop.f32.mrf.mxu1  ;;  %662 = vst [vmem:[%s1139_s20 + $0xa0] sm:$0xff] %v598_v46  ;;  %v599_v52 = vmax.f32 %v450_v48, 0.0  ;;  %v454_v54 = vadd.f32 %v453_v50, %v1129_v42 }
 0x107   : > { %694 = vst [vmem:[%s1139_s20 + $0x1a0] sm:$0xff] %v630_v47  ;;  %v631_v53 = vmax.f32 %v546_v49, 0.0  ;;  %v550_v55 = vadd.f32 %v549_v51, %v1129_v42  ;;  %v455_v56 = vpop.f32.mrf.mxu0 }
 0x108   : > { %v551_v57 = vpop.f32.mrf.mxu1  ;;  %663 = vst [vmem:[%s1139_s20 + $0xa8] sm:$0xff] %v599_v52  ;;  %v600_v58 = vmax.f32 %v454_v54, 0.0  ;;  %v456_v60 = vadd.f32 %v455_v56, %v1133_v43 }
 0x109   : > { %695 = vst [vmem:[%s1139_s20 + $0x1a8] sm:$0xff] %v631_v53  ;;  %v632_v59 = vmax.f32 %v550_v55, 0.0  ;;  %v552_v61 = vadd.f32 %v551_v57, %v1133_v43  ;;  %v459_v62 = vpop.f32.mrf.mxu0 }
 0x10a   : > { %v555_v63 = vpop.f32.mrf.mxu1  ;;  %664 = vst [vmem:[%s1139_s20 + $0xb0] sm:$0xff] %v600_v58  ;;  %v601_v0 = vmax.f32 %v456_v60, 0.0  ;;  %v460_v2 = vadd.f32 %v459_v62, %v1129_v42 }
 0x10b   : > { %696 = vst [vmem:[%s1139_s20 + $0x1b0] sm:$0xff] %v632_v59  ;;  %v633_v1 = vmax.f32 %v552_v61, 0.0  ;;  %v556_v3 = vadd.f32 %v555_v63, %v1129_v42  ;;  %v461_v4 = vpop.f32.mrf.mxu0 }
 0x10c   : > { %v557_v5 = vpop.f32.mrf.mxu1  ;;  %665 = vst [vmem:[%s1139_s20 + $0xb8] sm:$0xff] %v601_v0  ;;  %v602_v6 = vmax.f32 %v460_v2, 0.0  ;;  %v462_v8 = vadd.f32 %v461_v4, %v1133_v43 }
 0x10d   : > { %697 = vst [vmem:[%s1139_s20 + $0x1b8] sm:$0xff] %v633_v1  ;;  %v634_v7 = vmax.f32 %v556_v3, 0.0  ;;  %v558_v9 = vadd.f32 %v557_v5, %v1133_v43  ;;  %v465_v10 = vpop.f32.mrf.mxu0 }
 0x10e   : > { %v561_v11 = vpop.f32.mrf.mxu1  ;;  %666 = vst [vmem:[%s1139_s20 + $0xc0] sm:$0xff] %v602_v6  ;;  %v603_v12 = vmax.f32 %v462_v8, 0.0  ;;  %v466_v14 = vadd.f32 %v465_v10, %v1129_v42 }
 0x10f   : > { %698 = vst [vmem:[%s1139_s20 + $0x1c0] sm:$0xff] %v634_v7  ;;  %v635_v13 = vmax.f32 %v558_v9, 0.0  ;;  %v562_v15 = vadd.f32 %v561_v11, %v1129_v42  ;;  %v467_v16 = vpop.f32.mrf.mxu0 }
 0x110   : > { %v563_v17 = vpop.f32.mrf.mxu1  ;;  %667 = vst [vmem:[%s1139_s20 + $0xc8] sm:$0xff] %v603_v12  ;;  %v604_v18 = vmax.f32 %v466_v14, 0.0  ;;  %v468_v20 = vadd.f32 %v467_v16, %v1133_v43 }
 0x111   : > { %699 = vst [vmem:[%s1139_s20 + $0x1c8] sm:$0xff] %v635_v13  ;;  %v636_v19 = vmax.f32 %v562_v15, 0.0  ;;  %v564_v21 = vadd.f32 %v563_v17, %v1133_v43  ;;  %v471_v22 = vpop.f32.mrf.mxu0 }
 0x112   : > { %v567_v23 = vpop.f32.mrf.mxu1  ;;  %668 = vst [vmem:[%s1139_s20 + $0xd0] sm:$0xff] %v604_v18  ;;  %v605_v24 = vmax.f32 %v468_v20, 0.0  ;;  %v472_v26 = vadd.f32 %v471_v22, %v1129_v42 }
 0x113   : > { %700 = vst [vmem:[%s1139_s20 + $0x1d0] sm:$0xff] %v636_v19  ;;  %v637_v25 = vmax.f32 %v564_v21, 0.0  ;;  %v568_v27 = vadd.f32 %v567_v23, %v1129_v42  ;;  %v473_v28 = vpop.f32.mrf.mxu0 }
 0x114   : > { %v569_v29 = vpop.f32.mrf.mxu1  ;;  %669 = vst [vmem:[%s1139_s20 + $0xd8] sm:$0xff] %v605_v24  ;;  %v606_v30 = vmax.f32 %v472_v26, 0.0  ;;  %v474_v32 = vadd.f32 %v473_v28, %v1133_v43 }
 0x115   : > { %701 = vst [vmem:[%s1139_s20 + $0x1d8] sm:$0xff] %v637_v25  ;;  %v638_v31 = vmax.f32 %v568_v27, 0.0  ;;  %v570_v33 = vadd.f32 %v569_v29, %v1133_v43  ;;  %v477_v34 = vpop.f32.mrf.mxu0 }
 0x116   : > { %v573_v35 = vpop.f32.mrf.mxu1  ;;  %670 = vst [vmem:[%s1139_s20 + $0xe0] sm:$0xff] %v606_v30  ;;  %v607_v36 = vmax.f32 %v474_v32, 0.0  ;;  %v478_v38 = vadd.f32 %v477_v34, %v1129_v42 }
 0x117   : > { %702 = vst [vmem:[%s1139_s20 + $0x1e0] sm:$0xff] %v638_v31  ;;  %v639_v37 = vmax.f32 %v570_v33, 0.0  ;;  %v574_v39 = vadd.f32 %v573_v35, %v1129_v42  ;;  %v479_v40 = vpop.f32.mrf.mxu0 }
 0x118   : > { %v575_v41 = vpop.f32.mrf.mxu1  ;;  %671 = vst [vmem:[%s1139_s20 + $0xe8] sm:$0xff] %v607_v36  ;;  %v608_v44 = vmax.f32 %v478_v38, 0.0  ;;  %v480_v46 = vadd.f32 %v479_v40, %v1133_v43 }
 0x119   : > { %703 = vst [vmem:[%s1139_s20 + $0x1e8] sm:$0xff] %v639_v37  ;;  %v640_v45 = vmax.f32 %v574_v39, 0.0  ;;  %v576_v47 = vadd.f32 %v575_v41, %v1133_v43 }
 0x11a   : > { %672 = vst [vmem:[%s1139_s20 + $0xf0] sm:$0xff] %v608_v44  ;;  %v609_v42 = vmax.f32 %v480_v46, 0.0 }
 0x11b   : > { %704 = vst [vmem:[%s1139_s20 + $0x1f0] sm:$0xff] %v640_v45  ;;  %v641_v48 = vmax.f32 %v576_v47, 0.0 }
 0x11c   : > { %673 = vst [vmem:[%s1139_s20 + $0xf8] sm:$0xff] %v609_v42 }
 0x11d   : > { %705 = vst [vmem:[%s1139_s20 + $0x1f8] sm:$0xff] %v641_v48 }
 0x11e   : > { %889 = shalt.err (!%p886_p3)
}
 0x11f   : > { %s890_s6 = scalar_lea.hbm %s1266_s28, 8192  ;;  %s894_s9 = scalar_lea.hbm %s1319_s3, 16384 }
 0x120   : > { %p891_p4 = scmp.ne.s32.totalorder %s1266_s28, %s890_s6  ;;  %p895_p9 = scmp.lt.s32.totalorder %s1266_s28, %s1319_s3 }
 0x121   : > { %p896_p10 = scmp.lt.s32.totalorder %s894_s9, %s890_s6 }
 0x122   : > { %p892_p7 = pnand %p891_p4, %p1000_p5 }
 0x123   : > { %p897_p11 = por %p896_p10, %p895_p9 }
 0x124   : > { %p893_p8 = pneg %p892_p7 }
 0x126   : > { %p898_p12 = pnand %p897_p11, %p893_p8 }
 0x128   : > { %901 = shalt.err (!%p898_p12)
}
 0x129   : > { %s940_s17 = smov 256   ;;  %s941_s19 = smov 16  }
 0x12a   : > { %834 = dma.vmem_to_hbm [thread:$0]  (%p1000_p5), %s1268_s25, 8192, %s1266_s28, %s1276_s16, %s940_s17, %s940_s17, %s941_s19  }
 0x12b PF: > { %p840_p13 = scmp.ge.s32.totalorder %s936_s15, 2  ;;  %s735_s20 = sand.u32 1, %s924_s12  }
 0x12c   : > { %s736_s24 = scalar_lea.sflag [#allocation3], %s735_s20 }
 0x12d   : > { %p837_p0 = pnand %p840_p13, %p1004_p6 }
 0x12f   : > { %p838_p1 = pneg %p837_p0 }
 0x131   : > { %919 = dma.done.wait (%p838_p1), %s736_s24, 8192  }
 0x132   : > { %921 = vsyncadd (%p838_p1), %s736_s24, 4294959104  ;;  %p13_p2 = scmp.ge.s32.totalorder %s987_s18, 4   ;;  %s1322_s12 = smov %s928_s13 }
 0x133   : > { %s1323_s13 = smov %s932_s14  ;;  %s1324_s14 = smov %s998_s21 }
 0x134   : > { %s1325_s15 = smov %s987_s18  ;;  %15 = sbr.rel (!%p13_p2) target bundleno = 3 (0x3), region = 67 }
 0x139   :  { %741 = vsyncpa [#allocation3], 1 }
 0x13a   :  { %743 = vsyncpa [#allocation3 + $0x1], 1 }

</bundles_post_ra>
